<compile_context>
chip_gen: v7x
topology: tpu7x:2x2x1
jax: 0.10.0
libtpu: 0.0.40
codegen_flags: <defaults>
</compile_context>

<pallas_src>
import math

import jax
import jax.numpy as jnp
from jax import lax
from jax.experimental import pallas as pl
from jax.experimental.pallas import tpu as pltpu


def _weighted_sum_kernel(bar_ref, x_ref, o_ref):
    # bar_ref: (TB, K, CL)     f32 gates, lane-tiled so CL is 128-friendly
    # x_ref  : (TB, K, TS, CL) input tile (native dtype)
    # o_ref  : (TB, TS, CL)    output tile
    #
    # Always multiply-accumulate in f32: removes per-step gate casts, keeps
    # v5e's non-bf16 VPU on a clean f32 path, and improves bf16 numerics.
    k = x_ref.shape[1]
    acc = x_ref[:, 0, :, :].astype(jnp.float32) * bar_ref[:, 0, :][:, None, :]
    for j in range(1, k):                          # unrolled, K tiny (=3)
        acc = acc + (x_ref[:, j, :, :].astype(jnp.float32)
                     * bar_ref[:, j, :][:, None, :])
    o_ref[...] = acc.astype(o_ref.dtype)


def _vmem_ceiling_bytes():
    """Generation-aware VMEM ceiling: ~75% of physical capacity.

    v5e/v6e: 128 MiB -> ~96 MiB; v7x: 64 MiB -> ~48 MiB.  Conservative 48 MiB
    fallback if the query is unavailable.
    """
    try:
        info = pltpu.get_tpu_info()
        cap = getattr(info, "vmem_capacity_bytes", None)
        if cap:
            return int(cap) * 3 // 4
    except Exception:
        pass
    return 48 << 20


def _pick_block_sizes(b, k, s, cl, itemsize, target_bytes):
    """(TB, TS): divisors of (b, s); ~target_bytes x-tiles; >= 2 grid steps
    whenever the shape allows (so both v7x TensorCores get sharded work)."""
    row_bytes = k * cl * itemsize
    ts_opts = [d for d in range(1, s + 1) if s % d == 0 and (d % 8 == 0 or d == s)]
    fitting = [d for d in ts_opts if d * row_bytes <= target_bytes]
    if not fitting:
        fitting = [min(ts_opts)]
    # Prefer the largest tile that still leaves >= 2 total grid steps
    # (counting the batch axis at tb=1); fall back to the largest tile.
    two_step = [d for d in fitting if b * (s // d) >= 2]
    ts = max(two_step) if two_step else max(fitting)
    tb = 1
    for d in range(1, b + 1):
        if b % d:
            continue
        if d * ts * row_bytes <= target_bytes and (b // d) * (s // ts) >= 2:
            tb = d
    return tb, ts


def split_attention(x, w1, w2, k=3):
    """x: (B, K, H, W, C); w1: (C, C) = mlp1.weight; w2: (K*C, C) = mlp2.weight."""
    b, kk, h, w, c = x.shape
    assert kk == k
    hw = h * w
    x4 = x.reshape(b, k, hw, c)

    # ---- gating MLP, hoisted to plain XLA (tiny batched matmuls) ----
    # dtype=f32 on the reduce => fused f32 accumulation, no f32 copy of x.
    a = jnp.sum(x4, axis=(1, 2), dtype=jnp.float32)                   # (b, c)
    h1 = lax.dot_general(a, w1.astype(jnp.float32),
                         (((1,), (1,)), ((), ())))                    # a @ w1.T
    g = jax.nn.gelu(h1, approximate=False)                            # exact erf GELU
    hat = lax.dot_general(g, w2.astype(jnp.float32),
                          (((1,), (1,)), ((), ())))                   # (b, k*c)
    bar = jax.nn.softmax(hat.reshape(b, k, c), axis=1)                # (b, k, c) f32

    # ---- lane-dense folding: fold r spatial rows into the channel dim so the
    #      Pallas minor dim is a multiple of 128 (dense vst, not vst.msk) ----
    pad = 0
    if c % 128 == 0:
        r = 1
    elif 128 % c == 0:
        r = 128 // c
        pad = (-hw) % r
        if pad:
            # Keep the lane-dense fast path for awkward HW: zero-pad spatial,
            # slice the output back afterwards (negligible extra traffic).
            x4 = jnp.pad(x4, ((0, 0), (0, 0), (0, pad), (0, 0)))
    else:
        r = 1  # TODO(synk): C not dividing 128 falls back to masked stores.
    hw_p = hw + pad
    cl = r * c
    s = hw_p // r
    x_f = x4.reshape(b, k, s, cl)                        # free, contiguous reshape
    bar_t = jnp.tile(bar, (1, 1, r)) if r > 1 else bar   # (b, k, cl), tiny, f32

    itemsize = jnp.dtype(x.dtype).itemsize
    ceiling = _vmem_ceiling_bytes()
    target_bytes = min(8 << 20, max(2 << 20, ceiling // 6))
    tb, ts = _pick_block_sizes(b, k, s, cl, itemsize, target_bytes)
    grid = (b // tb, s // ts)

    # VMEM budget: double-buffered in/out blocks + in-kernel f32 accumulator
    # and broadcast temporaries + slack, clamped to the per-chip ceiling.
    x_blk = tb * k * ts * cl * itemsize
    bar_blk = tb * k * cl * 4
    out_blk = tb * ts * cl * itemsize
    acc_tmp = 2 * tb * ts * cl * 4
    need = 2 * (x_blk + bar_blk + out_blk) + acc_tmp + (2 << 20)
    vmem_limit = int(min(max(need, 16 << 20), ceiling))

    cost = pl.CostEstimate(
        flops=2 * b * k * s * cl,
        transcendentals=0,
        bytes_accessed=(k + 1) * b * s * cl * itemsize + b * k * cl * 4,
    )

    out_f = pl.pallas_call(
        _weighted_sum_kernel,
        out_shape=jax.ShapeDtypeStruct((b, s, cl), x.dtype),
        grid_spec=pltpu.PrefetchScalarGridSpec(
            num_scalar_prefetch=0,
            grid=grid,
            in_specs=[
                pl.BlockSpec((tb, k, cl), lambda i, j: (i, 0, 0)),
                pl.BlockSpec((tb, k, ts, cl), lambda i, j: (i, 0, j, 0)),
            ],
            out_specs=pl.BlockSpec((tb, ts, cl), lambda i, j: (i, j, 0)),
        ),
        compiler_params=pltpu.CompilerParams(
            dimension_semantics=("parallel", "parallel"),
            vmem_limit_bytes=vmem_limit),
        cost_estimate=cost,
    )(bar_t, x_f)

    out = out_f.reshape(b, hw_p, c)
    if pad:
        out = out[:, :hw, :]
    return out.reshape(b, h, w, c)


def split_attention_ref(x, w1, w2, k=3):
    """Plain-JAX reference mirroring the PyTorch forward (f32 math)."""
    b, kk, h, w_, c = x.shape
    xr = x.reshape(b, k, -1, c).astype(jnp.float32)
    a = jnp.sum(jnp.sum(xr, axis=1), axis=1)                    # (b, c)
    h1 = a @ w1.astype(jnp.float32).T
    g = 0.5 * h1 * (1.0 + lax.erf(h1 / jnp.sqrt(2.0)))
    hat = (g @ w2.astype(jnp.float32).T).reshape(b, k, c)
    bar = jax.nn.softmax(hat, axis=1)
    out = jnp.sum(bar[:, :, None, :] * xr, axis=1).reshape(b, h, w_, c)
    return out


if __name__ == "__main__":
    key = jax.random.PRNGKey(0)
    b, k, h, w, c = 2, 3, 8, 8, 32       # hidden_dim = c = 32, k = 3
    kx, k1, k2 = jax.random.split(key, 3)

    x = jax.random.normal(kx, (b, k, h, w, c), dtype=jnp.float32)
    # Deterministic nn.Linear-style init: U(-1/sqrt(in), 1/sqrt(in)), no bias.
    bound = 1.0 / math.sqrt(c)
    w1 = jax.random.uniform(k1, (c, c), jnp.float32, -bound, bound)       # mlp1.weight
    w2 = jax.random.uniform(k2, (c * k, c), jnp.float32, -bound, bound)   # mlp2.weight

    # ---- f32 path ----
    out = split_attention(x, w1, w2, k=k)
    out = jax.block_until_ready(out)
    ref = split_attention_ref(x, w1, w2, k=k)
    assert out.shape == (b, h, w, c)
    err = float(jnp.max(jnp.abs(out - ref)))
    assert jnp.allclose(out, ref, atol=2e-5, rtol=2e-5), f"max abs err {err}"

    # ---- bf16 path (f32 accumulation inside the kernel) ----
    x_bf = x.astype(jnp.bfloat16)
    out_bf = split_attention(x_bf, w1, w2, k=k)
    out_bf = jax.block_until_ready(out_bf)
    ref_bf = split_attention_ref(x_bf, w1, w2, k=k)
    err_bf = float(jnp.max(jnp.abs(out_bf.astype(jnp.float32) - ref_bf)))
    assert err_bf < 5e-2, f"bf16 max abs err {err_bf}"

    print("KERNEL_OK")
</pallas_src>

<mosaic_0001>
module attributes {stable_mosaic.version = 11 : i64} {
  func.func @_weighted_sum_kernel(%arg0: i32, %arg1: i32, %arg2: memref<1x3x128xf32, #tpu.memory_space<vmem>>, %arg3: memref<1x3x16x128xf32, #tpu.memory_space<vmem>>, %arg4: memref<1x16x128xf32, #tpu.memory_space<vmem>>) attributes {dimension_semantics = [#tpu.dimension_semantics<parallel>, #tpu.dimension_semantics<parallel>], iteration_bounds = array<i64: 2, 1>, scalar_prefetch = 0 : i64, scratch_operands = 0 : i64, tpu.core_type = #tpu.core_type<tc>, window_params = [{transform_indices = @transform_0, window_bounds = array<i64: 1, 3, 128>}, {transform_indices = @transform_1, window_bounds = array<i64: 1, 3, 16, 128>}, {transform_indices = @transform_2, window_bounds = array<i64: 1, 16, 128>}]} {
    %c0 = arith.constant 0 : index
    %c0_0 = arith.constant 0 : index
    %c0_1 = arith.constant 0 : index
    %c0_2 = arith.constant 0 : index
    %0 = vector.load %arg3[%c0, %c0_0, %c0_1, %c0_2] : memref<1x3x16x128xf32, #tpu.memory_space<vmem>>, vector<1x1x16x128xf32>
    %1 = vector.shape_cast %0 : vector<1x1x16x128xf32> to vector<1x16x128xf32>
    %c0_3 = arith.constant 0 : index
    %c0_4 = arith.constant 0 : index
    %c0_5 = arith.constant 0 : index
    %2 = vector.load %arg2[%c0_3, %c0_4, %c0_5] : memref<1x3x128xf32, #tpu.memory_space<vmem>>, vector<1x1x128xf32>
    %3 = vector.shape_cast %2 : vector<1x1x128xf32> to vector<1x128xf32>
    %4 = vector.shape_cast %3 : vector<1x128xf32> to vector<1x1x128xf32>
    %5 = vector.broadcast %4 : vector<1x1x128xf32> to vector<1x16x128xf32>
    %6 = arith.mulf %1, %5 : vector<1x16x128xf32>
    %c0_6 = arith.constant 0 : index
    %c1 = arith.constant 1 : index
    %c0_7 = arith.constant 0 : index
    %c0_8 = arith.constant 0 : index
    %7 = vector.load %arg3[%c0_6, %c1, %c0_7, %c0_8] : memref<1x3x16x128xf32, #tpu.memory_space<vmem>>, vector<1x1x16x128xf32>
    %8 = vector.shape_cast %7 : vector<1x1x16x128xf32> to vector<1x16x128xf32>
    %c0_9 = arith.constant 0 : index
    %c1_10 = arith.constant 1 : index
    %c0_11 = arith.constant 0 : index
    %9 = vector.load %arg2[%c0_9, %c1_10, %c0_11] : memref<1x3x128xf32, #tpu.memory_space<vmem>>, vector<1x1x128xf32>
    %10 = vector.shape_cast %9 : vector<1x1x128xf32> to vector<1x128xf32>
    %11 = vector.shape_cast %10 : vector<1x128xf32> to vector<1x1x128xf32>
    %12 = vector.broadcast %11 : vector<1x1x128xf32> to vector<1x16x128xf32>
    %13 = arith.mulf %8, %12 : vector<1x16x128xf32>
    %14 = arith.addf %6, %13 : vector<1x16x128xf32>
    %c0_12 = arith.constant 0 : index
    %c2 = arith.constant 2 : index
    %c0_13 = arith.constant 0 : index
    %c0_14 = arith.constant 0 : index
    %15 = vector.load %arg3[%c0_12, %c2, %c0_13, %c0_14] : memref<1x3x16x128xf32, #tpu.memory_space<vmem>>, vector<1x1x16x128xf32>
    %16 = vector.shape_cast %15 : vector<1x1x16x128xf32> to vector<1x16x128xf32>
    %c0_15 = arith.constant 0 : index
    %c2_16 = arith.constant 2 : index
    %c0_17 = arith.constant 0 : index
    %17 = vector.load %arg2[%c0_15, %c2_16, %c0_17] : memref<1x3x128xf32, #tpu.memory_space<vmem>>, vector<1x1x128xf32>
    %18 = vector.shape_cast %17 : vector<1x1x128xf32> to vector<1x128xf32>
    %19 = vector.shape_cast %18 : vector<1x128xf32> to vector<1x1x128xf32>
    %20 = vector.broadcast %19 : vector<1x1x128xf32> to vector<1x16x128xf32>
    %21 = arith.mulf %16, %20 : vector<1x16x128xf32>
    %22 = arith.addf %14, %21 : vector<1x16x128xf32>
    %c0_18 = arith.constant 0 : index
    %c0_19 = arith.constant 0 : index
    %c0_20 = arith.constant 0 : index
    %23 = vector.load %arg4[%c0_18, %c0_19, %c0_20] : memref<1x16x128xf32, #tpu.memory_space<vmem>>, vector<1x16x128xf32>
    tpu.vector_store %arg4[%c0_18, %c0_19, %c0_20], %22 {strides = array<i32>} : memref<1x16x128xf32, #tpu.memory_space<vmem>>, vector<1x16x128xf32>,
    return
  }
  func.func @transform_0(%arg0: i32, %arg1: i32) -> (i32, i32, i32) {
    %c0_i32 = arith.constant 0 : i32
    %c0_i32_0 = arith.constant 0 : i32
    %c0_i32_1 = arith.constant 0 : i32
    return %arg0, %c0_i32, %c0_i32_0 : i32, i32, i32
  }
  func.func @transform_1(%arg0: i32, %arg1: i32) -> (i32, i32, i32, i32) {
    %c0_i32 = arith.constant 0 : i32
    %c0_i32_0 = arith.constant 0 : i32
    %c0_i32_1 = arith.constant 0 : i32
    return %arg0, %c0_i32, %arg1, %c0_i32_0 : i32, i32, i32, i32
  }
  func.func @transform_2(%arg0: i32, %arg1: i32) -> (i32, i32, i32) {
    %c0_i32 = arith.constant 0 : i32
    %c0_i32_0 = arith.constant 0 : i32
    return %arg0, %arg1, %c0_i32 : i32, i32, i32
  }
}

</mosaic_0001>

<bundles_post_ra>
// kernel: tpu_custom_call.1
= control target key start
LH: loop header
LB: loop body
LE: loop exit
PB: predicated region body
PF: predicated region fallthrough
CT: control target
= control target key end

     0   :  { %7 = vsyncpa [#allocation3], 0  ;;  %s755_s0 = inlined_call_operand.vmem [shape: f32[2,3,128], index: 0, kind: input, shape index: {}]   ;;  %s756_s1 = inlined_call_operand.hbm [shape: f32[2,3,16,128], index: 1, kind: input, shape index: {}]   ;;  %s757_s2 = inlined_call_operand.hbm [shape: f32[2,16,128], index: 2, kind: output, shape index: {}]  }
   0x1   :  { %9 = vsyncpa [#allocation3 + $0x1], 0 }
   0x2   :  { %10 = vsyncpa [#allocation4], 0 }
   0x3   :  { %12 = vsyncpa [#allocation4 + $0x1], 0  ;;  %s574_s9 = smov 0   ;;  %s576_s10 = smov 0  }
   0x4   :  { %s578_s11 = smov 0   ;;  %s580_s12 = smov 0  }
   0x5   :  { %s582_s13 = smov 0   ;;  %s584_s14 = smov 0  }
   0x6 LB: > { %s349_s15 = sadd.s32 4294967295, %s551_s14   ;;  %s350_s16 = sadd.s32 4294967294, %s551_s14   ;;  %s551_s14 = sphi %s584_s14, %s18_s14   ;;  %s547_s13 = sphi %s582_s13, %s772_s13   ;;  %s543_s12 = sphi %s580_s12, %s771_s12   ;;  %s539_s11 = sphi %s578_s11, %s770_s11   ;;  %s535_s10 = sphi %s576_s10, %s769_s10   ;;  %s531_s9 = sphi %s574_s9, %s768_s9  }
   0x7   : > { %s30_s17 = sadd.s32 1, %s547_s13  ;;  %s65_s18 = sadd.s32 1, %s539_s11 }
   0x8   : > { %p32_p0 = scmp.ge.s32.totalorder %s30_s17, 2  ;;  %p72_p1 = scmp.ne.s32.totalorder %s539_s11, %s535_s10 }
   0x9   : > { %p73_p2 = scmp.eq.s32.totalorder %s551_s14, 0  ;;  %p78_p3 = scmp.ne.s32.totalorder %s535_s10, %s531_s9 }
   0xa   : > { %s774_s17 = smov (%p32_p0, %s30_s17), 0  ;;  %p79_p5 = scmp.eq.s32.totalorder %s349_s15, 0 }
   0xb   : > { %p615_p4 = por %p73_p2, %p72_p1  ;;  %s60_s20 = ssub.s32 %s547_s13, %s774_s17 }
   0xc   : > { %p104_p6 = scmp.eq.s32.totalorder %s349_s15, 1  ;;  %p63_p7 = scmp.eq.s32.totalorder %s60_s20, 0 }
   0xd   : > { %p621_p8 = por %p79_p5, %p78_p3  ;;  %p110_p10 = scmp.eq.s32.totalorder %s350_s16, 1 }
   0xe   : > { %p625_p9 = por %p104_p6, %p72_p1  ;;  %p385_p13 = scmp.lt.s32.totalorder %s551_s14, 2 }
   0xf   : > { %s630_s23 = scalar_select %p63_p7, %s539_s11, %s65_s18  }
  0x10   : > { %s761_s22 = scalar_select %p625_p9, 1, 0 }
  0x11   : > { %p632_p11 = por %p110_p10, %p78_p3  ;;  %s137_s25 = sand.u32 1, %s539_s11  }
  0x12   : > { %s370_s26 = smul.u32 48, %s137_s25  ;;  %p642_p0 = pnand %p385_p13, %p615_p4 }
  0x13   : > { %s762_s24 = scalar_select %p632_p11, 1, 0 }
  0x14   : > { %s371_s27 = smul.u32 768, %s547_s13  ;;  %s141_s4 = scalar_lea.vmem [#allocation2], %s370_s26 }
  0x15   : > { %s150_s5 = sshll.u32 %s141_s4, 4  ;;  %s654_s6 = scalar_lea.sflag [#allocation3], %s137_s25  ;;  %s651_s5 = int_to_ptr.vmem [resolvable:$true] %s150_s5 }
  0x16   : > { %s649_s3 = scalar_lea.hbm %s756_s1, %s371_s27  ;;  %p441_p3 = pneg %p642_p0 }
  0x17   : > { %s439_s7 = scalar_lea.hbm %s649_s3, 768  ;;  %s444_s16 = scalar_lea.hbm %s756_s1, 1536 }
  0x18   : > { %p440_p2 = scmp.ne.s32.totalorder %s649_s3, %s439_s7  ;;  %p445_p6 = scmp.lt.u32.totalorder %s649_s3, %s756_s1 }
  0x19   : > { %p446_p7 = scmp.lt.u32.totalorder %s444_s16, %s439_s7  ;;  %p448_p13 = scmp.lt.u32.totalorder %s439_s7, %s649_s3 }
  0x1a   : > { %p442_p4 = pnand %p441_p3, %p440_p2 }
  0x1b   : > { %p447_p10 = por %p446_p7, %p445_p6 }
  0x1c   : > { %p443_p5 = pneg %p442_p4 }
  0x1d   : > { %p449_p12 = por %p448_p13, %p447_p10 }
  0x1f   : > { %p450_p1 = pnand %p449_p12, %p443_p5 }
  0x21   : > { %453 = shalt.err (!%p450_p1)
}
  0x22   : > { %s454_s20 = scalar_lea.vmem %s651_s5, 768  ;;  %s553_s25 = smov [#allocation2]  }
  0x23   : > { %p455_p2 = scmp.ne.s32.totalorder %s651_s5, %s454_s20  ;;  %s459_s26 = sshll.u32 %s553_s25, 4  ;;  %s460_s26 = int_to_ptr.vmem [resolvable:$false] %s459_s26 }
  0x24   : > { %s461_s27 = scalar_lea.vmem %s460_s26, 1536  ;;  %p462_p9 = scmp.lt.s32.totalorder %s651_s5, %s460_s26 }
  0x25   : > { %p457_p4 = pnand %p455_p2, %p441_p3  ;;  %p463_p6 = scmp.lt.s32.totalorder %s461_s27, %s454_s20 }
  0x27   : > { %p458_p11 = pneg %p457_p4  ;;  %p464_p7 = por %p463_p6, %p462_p9 }
  0x29   : > { %p465_p10 = pnand %p464_p7, %p458_p11 }
  0x2b   : > { %468 = shalt.err (!%p465_p10)
}
  0x2c   : > { %s554_s29 = smov 128   ;;  %s555_s30 = smov 8  }
  0x2d   : > { %380 = dma.hbm_to_vmem [thread:$0]  (!%p642_p0), %s649_s3, 768, %s651_s5, %s654_s6, %s554_s29, %s554_s29, %s555_s30  }
  0x2e   : > { %p158_p12 = scmp.lt.s32.totalorder %s551_s14, 3  ;;  %p764_p1 = scmp.ge.s32.totalorder %s551_s14, 1 }
  0x30   : > { %p159_p3 = pnand %p764_p1, %p158_p12 }
  0x31   : > { %s686_s4 = sand.u32 (!%p159_p3), 1, %s535_s10  }
  0x32   : > { %162 = sbr.rel (%p159_p3) target bundleno = 88 (0x58), region = 28  ;;  %s165_s8 = scalar_lea.sflag (!%p159_p3), [#allocation3], %s686_s4 }
  0x33   : > { %s372_s7 = smul.u32 (!%p159_p3), 48, %s686_s4 }
  0x35   : > { %s168_s15 = scalar_lea.vmem (!%p159_p3), [#allocation2], %s372_s7 }
  0x39   : > { %522 = dma.done.wait (%p621_p8), %s165_s8, 768  }
  0x3a   : > { %524 = vsyncadd (%p621_p8), %s165_s8, 4294966528  ;;  %p193_p9 = scmp.lt.s32.totalorder %s543_s12, 1  ;;  %s355_s3 = sshll.u32 %s686_s4, 4  ;;  %v199_v0 = vld [vmem:[%s168_s15] sm:$0xff]  ;;  %v358_v2 = vld [vmem:[%s168_s15 + $0x10] sm:$0xff] }
  0x3b   : > { %v361_v5 = vld [vmem:[%s168_s15 + $0x20] sm:$0xff]  ;;  %v200_v9 = vld [vmem:[%s168_s15 + $0x8] sm:$0xff]  ;;  %v359_v10 = vld [vmem:[%s168_s15 + $0x18] sm:$0xff]  ;;  %s192_s21 = scalar_lea.vmem [#allocation5], %s355_s3  ;;  %s369_s20 = sshll.u32 %s543_s12, 8 }
  0x3c   : > { %s194_s28 = scalar_select %p193_p9, %s543_s12, 1  ;;  %v362_v11 = vld [vmem:[%s168_s15 + $0x28] sm:$0xff] }
  0x3d   : > { %s250_s19 = sshll.u32 %s192_s21, 4  ;;  %s706_s27 = scalar_lea.hbm %s757_s2, %s369_s20  ;;  %s701_s19 = int_to_ptr.vmem [resolvable:$true] %s250_s19 }
  0x3e   : > { %s356_s5 = sshll.u32 %s194_s28, 2  ;;  %s235_s29 = scalar_lea.sflag [#allocation4], %s686_s4 }
  0x3f   : > { %s196_s18 = scalar_lea.vmem %s755_s0, %s356_s5  ;;  %s469_s30 = scalar_lea.vmem %s701_s19, 256 }
  0x40   : > { %v357_v1 = vld [vmem:[%s196_s18] ss:$0 sm:$0xff]  ;;  %v360_v4 = vld [vmem:[%s196_s18 + $0x1] ss:$0 sm:$0xff]  ;;  %v363_v6 = vld [vmem:[%s196_s18 + $0x2] ss:$0 sm:$0xff]  ;;  %p470_p8 = scmp.ne.s32.totalorder %s701_s19, %s469_s30 }
  0x41   : > { %v206_v3 = vmul.f32 %v357_v1, %v199_v0  ;;  %v216_v7 = vmul.f32 %v360_v4, %v358_v2  ;;  %v228_v8 = vmul.f32 %v363_v6, %v361_v5  ;;  %v207_v12 = vmul.f32 %v357_v1, %v200_v9  ;;  %p765_p11 = scmp.ne.s32.totalorder %s761_s22, 0  ;;  %s556_s12 = smov [#allocation5]  }
  0x42   : > { %v217_v13 = vmul.f32 %v360_v4, %v359_v10  ;;  %v229_v14 = vmul.f32 %v363_v6, %v362_v11  ;;  %s473_s7 = sshll.u32 %s556_s12, 4  ;;  %s474_s7 = int_to_ptr.vmem [resolvable:$false] %s473_s7 }
  0x43   : > { %v218_v15 = vadd.f32 %v216_v7, %v206_v3  ;;  %p471_p0 = pnand %p470_p8, %p765_p11  ;;  %s475_s8 = scalar_lea.vmem %s474_s7, 512 }
  0x44   : > { %v219_v16 = vadd.f32 %v217_v13, %v207_v12  ;;  %p476_p13 = scmp.lt.s32.totalorder %s701_s19, %s474_s7  ;;  %p477_p2 = scmp.lt.s32.totalorder %s475_s8, %s469_s30 }
  0x45   : > { %v230_v17 = vadd.f32 %v228_v8, %v218_v15  ;;  %p472_p5 = pneg %p471_p0 }
  0x46   : > { %v231_v18 = vadd.f32 %v229_v14, %v219_v16  ;;  %p478_p4 = por %p477_p2, %p476_p13 }
  0x47   : > { %232 = vst [vmem:[%s192_s21] sm:$0xff] %v230_v17 }
  0x48   : > { %233 = vst [vmem:[%s192_s21 + $0x8] sm:$0xff] %v231_v18  ;;  %p479_p6 = pnand %p478_p4, %p472_p5 }
  0x4a   : > { %482 = shalt.err (!%p479_p6)
}
  0x4b   : > { %s483_s15 = scalar_lea.hbm %s706_s27, 256  ;;  %s487_s5 = scalar_lea.hbm %s757_s2, 512 }
  0x4c   : > { %p484_p7 = scmp.ne.s32.totalorder %s706_s27, %s483_s15  ;;  %p488_p1 = scmp.lt.u32.totalorder %s706_s27, %s757_s2 }
  0x4d   : > { %p489_p3 = scmp.lt.u32.totalorder %s487_s5, %s483_s15  ;;  %p491_p8 = scmp.lt.u32.totalorder %s483_s15, %s706_s27 }
  0x4e   : > { %p485_p10 = pnand %p484_p7, %p765_p11 }
  0x4f   : > { %p490_p9 = por %p489_p3, %p488_p1 }
  0x50   : > { %p486_p12 = pneg %p485_p10 }
  0x51   : > { %p492_p0 = por %p491_p8, %p490_p9 }
  0x53   : > { %p493_p5 = pnand %p492_p0, %p486_p12 }
  0x55   : > { %496 = shalt.err (!%p493_p5)
}
  0x56   : > { %s557_s18 = smov 128   ;;  %s558_s21 = smov 8  }
  0x57   : > { %375 = dma.vmem_to_hbm [thread:$0]  (%p765_p11), %s701_s19, 256, %s706_s27, %s235_s29, %s557_s18, %s557_s18, %s558_s21  }
  0x58 PF: > { %s265_s20 = sand.u32 1, %s531_s9   ;;  %p766_p13 = scmp.ne.s32.totalorder %s762_s24, 0 }
  0x59   : > { %p767_p2 = scmp.ge.s32.totalorder %s551_s14, 2  ;;  %s266_s25 = scalar_lea.sflag [#allocation4], %s265_s20 }
  0x5b   : > { %p382_p4 = pnand %p767_p2, %p766_p13 }
  0x5d   : > { %526 = dma.done.wait (!%p382_p4), %s266_s25, 256  }
  0x5e   : > { %528 = vsyncadd (!%p382_p4), %s266_s25, 4294967040  ;;  %s18_s14 = sadd.s32 1, %s551_s14   ;;  %s768_s9 = smov %s535_s10 }
  0x5f   : > { %p15_p6 = scmp.ge.s32.totalorder %s18_s14, 4   ;;  %s769_s10 = smov %s539_s11 }
  0x60   : > { %s770_s11 = smov %s630_s23  ;;  %s771_s12 = smov %s547_s13 }
  0x61   : > { %s772_s13 = smov %s774_s17  ;;  %17 = sbr.rel (!%p15_p6) target bundleno = 6 (0x6), region = 78 }
  0x68   :  { %271 = vsyncpa [#allocation3], 1 }
  0x69   :  { %273 = vsyncpa [#allocation3 + $0x1], 1 }
  0x6a   :  { %274 = vsyncpa [#allocation4], 1 }
  0x6b   :  { %276 = vsyncpa [#allocation4 + $0x1], 1 }

</bundles_post_ra>
